<compile_context>
chip_gen: v5e
topology: v5e:2x2
jax: 0.10.0
libtpu: 0.0.40
codegen_flags: <defaults>
</compile_context>

<pallas_src>
import jax
import jax.numpy as jnp
from jax.experimental import pallas as pl
from jax.experimental.pallas import tpu as pltpu


def _lstm_kernel(x_ref, h_ref, c0_ref, wi_ref, wh_all_ref, b_ref,
                 o_ref, hid_ref, cell_ref):
    # Shapes:
    #   x_ref, h_ref, c0_ref : (B, H)
    #   wi_ref               : (L, H, 4H)   fused input->hidden weights (i,f,g,o)
    #   wh_all_ref           : (H, L*4H)    fused hidden->hidden weights, all layers
    #   b_ref                : (L, 1, 4H)   pre-summed (bi + bh) biases
    H = x_ref.shape[1]
    L = wi_ref.shape[0]
    G = 4 * H

    x = x_ref[...]                 # running input_tensor, (B, H)
    c = c0_ref[...]                # running cell_state,   (B, H)

    # Hidden path is layer-independent: one well-shaped matmul for all
    # layers and gates -> (B, L*4H).
    h_all = jnp.dot(h_ref[...], wh_all_ref[...],
                    preferred_element_type=jnp.float32)

    o_t = None
    for l in range(L):             # static, unrolled (L is compile-time const)
        pre = (
            jnp.dot(x, wi_ref[l], preferred_element_type=jnp.float32)
            + h_all[:, l * G:(l + 1) * G]
            + b_ref[l]
        )                          # (B, 4H)
        i_t = jax.nn.sigmoid(pre[:, 0:H])
        f_t = jax.nn.sigmoid(pre[:, H:2 * H])
        g_t = jnp.tanh(pre[:, 2 * H:3 * H])
        o_t = jax.nn.sigmoid(pre[:, 3 * H:4 * H])

        c = f_t * c + i_t * g_t
        x = o_t * jnp.tanh(c)      # dropout == identity (eval mode)

    # Write outputs exactly once (last layer's values).
    o_ref[...] = o_t
    hid_ref[...] = x
    cell_ref[...] = c


def lstm_forward(x, hidden, cell_state, params, *, num_layers):
    """Returns (o_t, hidden, cell_state), matching the PyTorch forward."""
    (wii, whi, bii, bhi,
     wif, whf, bif, bhf,
     wig, whg, big, bhg,
     wio, who, bio, bho) = params

    L, H, _ = wii.shape
    assert L == num_layers
    B = x.shape[0]

    # Host-side fusion / layout prep (cheap, done once outside the kernel):
    # gate order is (i, f, g, o).
    wi = jnp.concatenate([wii, wif, wig, wio], axis=-1)            # [L, H, 4H]
    wh = jnp.concatenate([whi, whf, whg, who], axis=-1)            # [L, H, 4H]
    wh_all = jnp.transpose(wh, (1, 0, 2)).reshape(H, L * 4 * H)    # [H, L*4H]
    b = jnp.concatenate([bii + bhi, bif + bhf,
                         big + bhg, bio + bho], axis=-1)           # [L, 1, 4H]

    out_shape = (
        jax.ShapeDtypeStruct((B, H), jnp.float32),  # o_t
        jax.ShapeDtypeStruct((B, H), jnp.float32),  # hidden
        jax.ShapeDtypeStruct((B, H), jnp.float32),  # cell_state
    )

    vmem = pl.BlockSpec(memory_space=pltpu.MemorySpace.VMEM)
    fn = pl.pallas_call(
        _lstm_kernel,
        out_shape=out_shape,
        in_specs=[vmem] * 6,
        out_specs=(vmem, vmem, vmem),
    )
    return fn(x, hidden, cell_state, wi, wh_all, b)


def _reference_forward(x, hidden, cell_state, params, num_layers):
    (wii, whi, bii, bhi,
     wif, whf, bif, bhf,
     wig, whg, big, bhg,
     wio, who, bio, bho) = params
    inp, c = x, cell_state
    o_t = None
    for l in range(num_layers):
        i_t = jax.nn.sigmoid(inp @ wii[l] + bii[l] + hidden @ whi[l] + bhi[l])
        f_t = jax.nn.sigmoid(inp @ wif[l] + bif[l] + hidden @ whf[l] + bhf[l])
        g_t = jnp.tanh(inp @ wig[l] + big[l] + hidden @ whg[l] + bhg[l])
        o_t = jax.nn.sigmoid(bio[l] + hidden @ who[l] + bho[l] + inp @ wio[l])
        c = f_t * c + i_t * g_t
        inp = o_t * jnp.tanh(c)
    return o_t, inp, c


if __name__ == "__main__":
    hidden_size = 32
    num_layers = 2
    batch = 2

    H, L, B = hidden_size, num_layers, batch

    key = jax.random.PRNGKey(0)
    keys = jax.random.split(key, 20)

    # Deterministic normal init (matches nn.init.normal_: std normal).
    def w(k):
        return jax.random.normal(k, (L, H, H), dtype=jnp.float32)

    def b(k):
        return jax.random.normal(k, (L, 1, H), dtype=jnp.float32)

    params = (
        w(keys[0]), w(keys[1]), b(keys[2]), b(keys[3]),      # i gate
        w(keys[4]), w(keys[5]), b(keys[6]), b(keys[7]),      # f gate
        w(keys[8]), w(keys[9]), b(keys[10]), b(keys[11]),    # g gate
        w(keys[12]), w(keys[13]), b(keys[14]), b(keys[15]),  # o gate
    )

    x = jax.random.normal(keys[16], (B, H), dtype=jnp.float32)
    hidden = jax.random.normal(keys[17], (B, H), dtype=jnp.float32)
    cell0 = jnp.zeros((B, H), dtype=jnp.float32)  # initial_cell_state

    o_t, hid, cell = lstm_forward(x, hidden, cell0, params, num_layers=L)
    jax.block_until_ready((o_t, hid, cell))

    # Correctness check against a pure-JAX reference of the PyTorch forward.
    ro, rh, rc = _reference_forward(x, hidden, cell0, params, L)
    assert jnp.allclose(o_t, ro, atol=1e-5, rtol=1e-5)
    assert jnp.allclose(hid, rh, atol=1e-5, rtol=1e-5)
    assert jnp.allclose(cell, rc, atol=1e-5, rtol=1e-5)

    print("KERNEL_OK")
</pallas_src>

<mosaic_0001>
module attributes {stable_mosaic.version = 11 : i64} {
  func.func @_lstm_kernel(%arg0: memref<2x32xf32, #tpu.memory_space<vmem>>, %arg1: memref<2x32xf32, #tpu.memory_space<vmem>>, %arg2: memref<2x32xf32, #tpu.memory_space<vmem>>, %arg3: memref<2x32x128xf32, #tpu.memory_space<vmem>>, %arg4: memref<32x256xf32, #tpu.memory_space<vmem>>, %arg5: memref<2x1x128xf32, #tpu.memory_space<vmem>>, %arg6: memref<2x32xf32, #tpu.memory_space<vmem>>, %arg7: memref<2x32xf32, #tpu.memory_space<vmem>>, %arg8: memref<2x32xf32, #tpu.memory_space<vmem>>) attributes {dimension_semantics = [], scalar_prefetch = 0 : i64, scratch_operands = 0 : i64, tpu.core_type = #tpu.core_type<tc>} {
    %c0 = arith.constant 0 : index
    %c0_0 = arith.constant 0 : index
    %0 = vector.load %arg0[%c0, %c0_0] : memref<2x32xf32, #tpu.memory_space<vmem>>, vector<2x32xf32>
    %c0_1 = arith.constant 0 : index
    %c0_2 = arith.constant 0 : index
    %1 = vector.load %arg2[%c0_1, %c0_2] : memref<2x32xf32, #tpu.memory_space<vmem>>, vector<2x32xf32>
    %c0_3 = arith.constant 0 : index
    %c0_4 = arith.constant 0 : index
    %2 = vector.load %arg1[%c0_3, %c0_4] : memref<2x32xf32, #tpu.memory_space<vmem>>, vector<2x32xf32>
    %c0_5 = arith.constant 0 : index
    %c0_6 = arith.constant 0 : index
    %3 = vector.load %arg4[%c0_5, %c0_6] : memref<32x256xf32, #tpu.memory_space<vmem>>, vector<32x256xf32>
    %cst = arith.constant dense<0.000000e+00> : vector<2x256xf32>
    %4 = tpu.matmul %2, %3, %cst {dimension_numbers = #tpu.dot_dimension_numbers<[1], [0], [0], [1], [0, 0, 1, 1], [], []>} : vector<2x32xf32>, vector<32x256xf32>, vector<2x256xf32> -> vector<2x256xf32>
    %c0_7 = arith.constant 0 : index
    %c0_8 = arith.constant 0 : index
    %c0_9 = arith.constant 0 : index
    %5 = vector.load %arg3[%c0_7, %c0_8, %c0_9] : memref<2x32x128xf32, #tpu.memory_space<vmem>>, vector<1x32x128xf32>
    %6 = vector.shape_cast %5 : vector<1x32x128xf32> to vector<32x128xf32>
    %cst_10 = arith.constant dense<0.000000e+00> : vector<2x128xf32>
    %7 = tpu.matmul %0, %6, %cst_10 {dimension_numbers = #tpu.dot_dimension_numbers<[1], [0], [0], [1], [0, 0, 1, 1], [], []>} : vector<2x32xf32>, vector<32x128xf32>, vector<2x128xf32> -> vector<2x128xf32>
    %8 = vector.extract_strided_slice %4 {offsets = [0, 0], sizes = [2, 128], strides = [1, 1]} : vector<2x256xf32> to vector<2x128xf32>
    %9 = arith.addf %7, %8 : vector<2x128xf32>
    %c0_11 = arith.constant 0 : index
    %c0_12 = arith.constant 0 : index
    %c0_13 = arith.constant 0 : index
    %10 = vector.load %arg5[%c0_11, %c0_12, %c0_13] : memref<2x1x128xf32, #tpu.memory_space<vmem>>, vector<1x1x128xf32>
    %11 = vector.shape_cast %10 : vector<1x1x128xf32> to vector<1x128xf32>
    %12 = vector.broadcast %11 : vector<1x128xf32> to vector<2x128xf32>
    %13 = arith.addf %9, %12 : vector<2x128xf32>
    %14 = vector.extract_strided_slice %13 {offsets = [0, 0], sizes = [2, 32], strides = [1, 1]} : vector<2x128xf32> to vector<2x32xf32>
    %15 = arith.negf %14 : vector<2x32xf32>
    %16 = math.exp %15 : vector<2x32xf32>
    %cst_14 = arith.constant 1.000000e+00 : f32
    %17 = vector.broadcast %cst_14 : f32 to vector<2x32xf32>
    %18 = arith.addf %17, %16 : vector<2x32xf32>
    %19 = arith.divf %17, %18 : vector<2x32xf32>
    %20 = vector.extract_strided_slice %13 {offsets = [0, 32], sizes = [2, 32], strides = [1, 1]} : vector<2x128xf32> to vector<2x32xf32>
    %21 = arith.negf %20 : vector<2x32xf32>
    %22 = math.exp %21 : vector<2x32xf32>
    %cst_15 = arith.constant 1.000000e+00 : f32
    %23 = vector.broadcast %cst_15 : f32 to vector<2x32xf32>
    %24 = arith.addf %23, %22 : vector<2x32xf32>
    %25 = arith.divf %23, %24 : vector<2x32xf32>
    %26 = vector.extract_strided_slice %13 {offsets = [0, 64], sizes = [2, 32], strides = [1, 1]} : vector<2x128xf32> to vector<2x32xf32>
    %27 = math.tanh %26 : vector<2x32xf32>
    %28 = vector.extract_strided_slice %13 {offsets = [0, 96], sizes = [2, 32], strides = [1, 1]} : vector<2x128xf32> to vector<2x32xf32>
    %29 = arith.negf %28 : vector<2x32xf32>
    %30 = math.exp %29 : vector<2x32xf32>
    %cst_16 = arith.constant 1.000000e+00 : f32
    %31 = vector.broadcast %cst_16 : f32 to vector<2x32xf32>
    %32 = arith.addf %31, %30 : vector<2x32xf32>
    %33 = arith.divf %31, %32 : vector<2x32xf32>
    %34 = arith.mulf %25, %1 : vector<2x32xf32>
    %35 = arith.mulf %19, %27 : vector<2x32xf32>
    %36 = arith.addf %34, %35 : vector<2x32xf32>
    %37 = math.tanh %36 : vector<2x32xf32>
    %38 = arith.mulf %33, %37 : vector<2x32xf32>
    %c1 = arith.constant 1 : index
    %c0_17 = arith.constant 0 : index
    %c0_18 = arith.constant 0 : index
    %39 = vector.load %arg3[%c1, %c0_17, %c0_18] : memref<2x32x128xf32, #tpu.memory_space<vmem>>, vector<1x32x128xf32>
    %40 = vector.shape_cast %39 : vector<1x32x128xf32> to vector<32x128xf32>
    %cst_19 = arith.constant dense<0.000000e+00> : vector<2x128xf32>
    %41 = tpu.matmul %38, %40, %cst_19 {dimension_numbers = #tpu.dot_dimension_numbers<[1], [0], [0], [1], [0, 0, 1, 1], [], []>} : vector<2x32xf32>, vector<32x128xf32>, vector<2x128xf32> -> vector<2x128xf32>
    %42 = vector.extract_strided_slice %4 {offsets = [0, 128], sizes = [2, 128], strides = [1, 1]} : vector<2x256xf32> to vector<2x128xf32>
    %43 = arith.addf %41, %42 : vector<2x128xf32>
    %c1_20 = arith.constant 1 : index
    %c0_21 = arith.constant 0 : index
    %c0_22 = arith.constant 0 : index
    %44 = vector.load %arg5[%c1_20, %c0_21, %c0_22] : memref<2x1x128xf32, #tpu.memory_space<vmem>>, vector<1x1x128xf32>
    %45 = vector.shape_cast %44 : vector<1x1x128xf32> to vector<1x128xf32>
    %46 = vector.broadcast %45 : vector<1x128xf32> to vector<2x128xf32>
    %47 = arith.addf %43, %46 : vector<2x128xf32>
    %48 = vector.extract_strided_slice %47 {offsets = [0, 0], sizes = [2, 32], strides = [1, 1]} : vector<2x128xf32> to vector<2x32xf32>
    %49 = arith.negf %48 : vector<2x32xf32>
    %50 = math.exp %49 : vector<2x32xf32>
    %cst_23 = arith.constant 1.000000e+00 : f32
    %51 = vector.broadcast %cst_23 : f32 to vector<2x32xf32>
    %52 = arith.addf %51, %50 : vector<2x32xf32>
    %53 = arith.divf %51, %52 : vector<2x32xf32>
    %54 = vector.extract_strided_slice %47 {offsets = [0, 32], sizes = [2, 32], strides = [1, 1]} : vector<2x128xf32> to vector<2x32xf32>
    %55 = arith.negf %54 : vector<2x32xf32>
    %56 = math.exp %55 : vector<2x32xf32>
    %cst_24 = arith.constant 1.000000e+00 : f32
    %57 = vector.broadcast %cst_24 : f32 to vector<2x32xf32>
    %58 = arith.addf %57, %56 : vector<2x32xf32>
    %59 = arith.divf %57, %58 : vector<2x32xf32>
    %60 = vector.extract_strided_slice %47 {offsets = [0, 64], sizes = [2, 32], strides = [1, 1]} : vector<2x128xf32> to vector<2x32xf32>
    %61 = math.tanh %60 : vector<2x32xf32>
    %62 = vector.extract_strided_slice %47 {offsets = [0, 96], sizes = [2, 32], strides = [1, 1]} : vector<2x128xf32> to vector<2x32xf32>
    %63 = arith.negf %62 : vector<2x32xf32>
    %64 = math.exp %63 : vector<2x32xf32>
    %cst_25 = arith.constant 1.000000e+00 : f32
    %65 = vector.broadcast %cst_25 : f32 to vector<2x32xf32>
    %66 = arith.addf %65, %64 : vector<2x32xf32>
    %67 = arith.divf %65, %66 : vector<2x32xf32>
    %68 = arith.mulf %59, %36 : vector<2x32xf32>
    %69 = arith.mulf %53, %61 : vector<2x32xf32>
    %70 = arith.addf %68, %69 : vector<2x32xf32>
    %71 = math.tanh %70 : vector<2x32xf32>
    %72 = arith.mulf %67, %71 : vector<2x32xf32>
    %c0_26 = arith.constant 0 : index
    %c0_27 = arith.constant 0 : index
    %73 = vector.load %arg6[%c0_26, %c0_27] : memref<2x32xf32, #tpu.memory_space<vmem>>, vector<2x32xf32>
    tpu.vector_store %arg6[%c0_26, %c0_27], %67 {strides = array<i32>} : memref<2x32xf32, #tpu.memory_space<vmem>>, vector<2x32xf32>,
    %c0_28 = arith.constant 0 : index
    %c0_29 = arith.constant 0 : index
    %74 = vector.load %arg7[%c0_28, %c0_29] : memref<2x32xf32, #tpu.memory_space<vmem>>, vector<2x32xf32>
    tpu.vector_store %arg7[%c0_28, %c0_29], %72 {strides = array<i32>} : memref<2x32xf32, #tpu.memory_space<vmem>>, vector<2x32xf32>,
    %c0_30 = arith.constant 0 : index
    %c0_31 = arith.constant 0 : index
    %75 = vector.load %arg8[%c0_30, %c0_31] : memref<2x32xf32, #tpu.memory_space<vmem>>, vector<2x32xf32>
    tpu.vector_store %arg8[%c0_30, %c0_31], %70 {strides = array<i32>} : memref<2x32xf32, #tpu.memory_space<vmem>>, vector<2x32xf32>,
    return
  }
}

</mosaic_0001>

<bundles_post_ra>
// kernel: tpu_custom_call.1
= control target key start
LH: loop header
LB: loop body
LE: loop exit
PB: predicated region body
PF: predicated region fallthrough
CT: control target
= control target key end

     0   :  { %14 = vsyncpa [#allocation3], 0  ;;  %s720_s0 = inlined_call_operand.hbm [shape: f32[2,32], index: 0, kind: input, shape index: {}]   ;;  %s721_s1 = inlined_call_operand.hbm [shape: f32[2,32], index: 1, kind: input, shape index: {}]   ;;  %s722_s2 = inlined_call_operand.hbm [shape: f32[2,32], index: 2, kind: input, shape index: {}]   ;;  %s723_s3 = inlined_call_operand.hbm [shape: f32[2,32,128], index: 3, kind: input, shape index: {}]   ;;  %s724_s4 = inlined_call_operand.hbm [shape: f32[32,256], index: 4, kind: input, shape index: {}]   ;;  %s725_s5 = inlined_call_operand.vmem [shape: f32[2,1,128], index: 5, kind: input, shape index: {}]   ;;  %s726_s6 = inlined_call_operand.hbm [shape: f32[2,32], index: 6, kind: output, shape index: {0}]   ;;  %s727_s7 = inlined_call_operand.hbm [shape: f32[2,32], index: 7, kind: output, shape index: {1}]   ;;  %s728_s8 = inlined_call_operand.hbm [shape: f32[2,32], index: 8, kind: output, shape index: {2}]  }
   0x1   :  { %15 = vsyncpa [#allocation6], 0 }
   0x2   :  { %16 = vsyncpa [#allocation9], 0 }
   0x3   :  { %17 = vsyncpa [#allocation4], 0  ;;  %s35_s29 = sshll.u32 %s721_s1, 4  ;;  %s36_s29 = int_to_ptr.hbm [resolvable:$true] %s35_s29 }
   0x4   :  { %18 = vsyncpa [#allocation13], 0  ;;  %s609_s30 = smov [#allocation5]   ;;  %s56_s12 = sshll.u32 %s723_s3, 4  ;;  %s57_s12 = int_to_ptr.hbm [resolvable:$true] %s56_s12 }
   0x5   :  { %s37_s9 = sshll.u32 %s609_s30, 4  ;;  %s610_s13 = smov [#allocation8]   ;;  %s38_s9 = int_to_ptr.vmem [resolvable:$true] %s37_s9 }
   0x6   :  { %40 = dma.hbm_to_vmem [thread:$0]  %s36_s29, 32, %s38_s9, [#allocation6]  }
   0x7   :  { %s58_s14 = sshll.u32 %s610_s13, 4  ;;  %s611_s15 = smov 128   ;;  %s59_s14 = int_to_ptr.vmem [resolvable:$true] %s58_s14 }
   0x8   :  { %s612_s16 = smov 8   ;;  %s24_s1 = sshll.u32 %s720_s0, 4  ;;  %s25_s1 = int_to_ptr.hbm [resolvable:$true] %s24_s1 }
   0x9   :  { %64 = dma.hbm_to_vmem [thread:$0]  %s57_s12, 1024, %s59_s14, [#allocation9], %s611_s15, %s611_s15, %s612_s16  }
   0xa   :  { %s613_s19 = smov [#allocation2]   ;;  %s46_s3 = sshll.u32 %s722_s2, 4  ;;  %s47_s3 = int_to_ptr.hbm [resolvable:$true] %s46_s3 }
   0xb   :  { %s26_s20 = sshll.u32 %s613_s19, 4  ;;  %s614_s23 = smov [#allocation7]   ;;  %s27_s20 = int_to_ptr.vmem [resolvable:$true] %s26_s20 }
   0xc   :  { %29 = dma.hbm_to_vmem [thread:$0]  %s25_s1, 32, %s27_s20, [#allocation3]  }
   0xd   :  { %s48_s24 = sshll.u32 %s614_s23, 4  ;;  %s69_s27 = sshll.u32 %s724_s4, 4  ;;  %s49_s24 = int_to_ptr.vmem [resolvable:$true] %s48_s24  ;;  %s70_s27 = int_to_ptr.hbm [resolvable:$true] %s69_s27 }
   0xe   :  { %51 = dma.hbm_to_vmem [thread:$0]  %s47_s3, 32, %s49_s24, [#allocation6]  }
   0xf   :  { %s615_s0 = smov [#allocation10]   ;;  %s616_s29 = smov 256  }
  0x10   :  { %s71_s28 = sshll.u32 %s615_s0, 4  ;;  %s617_s30 = smov 16   ;;  %s72_s28 = int_to_ptr.vmem [resolvable:$true] %s71_s28 }
  0x11   :  { %77 = dma.hbm_to_vmem [thread:$0]  %s70_s27, 1024, %s72_s28, [#allocation9], %s616_s29, %s616_s29, %s617_s30  }
  0x12   :  { %599 = dma.done.wait [#allocation3], 32  }
  0x13   :  { %600 = vsyncadd [#allocation3], 4294967264 }
  0x14   :  { %601 = dma.done.wait [#allocation6], 64  }
  0x15   :  { %602 = vsyncadd [#allocation6], 4294967232 }
  0x16   :  { %603 = dma.done.wait [#allocation9], 2048  }
  0x17   :  { %604 = vsyncadd [#allocation9], 4294965248  ;;  %v158_v0 = vld [vmem:[#allocation8 + $0x18] sm:$0xff]  ;;  %v157_v1 = vld [vmem:[#allocation8 + $0x10] sm:$0xff]  ;;  %vm111_vm0 = vcmask 261120   ;;  %s618_s9 = smov 64  }
  0x18   :  { %174 = vmatpush.msra.mxu2 %v158_v0  ;;  %v109_v2 = vld [vmem:[#allocation10 + $0x30] sm:$0xff]  ;;  %v156_v3 = vld [vmem:[#allocation8 + $0x8] sm:$0xff]  ;;  %v107_v4 = vld [vmem:[#allocation10 + $0x20] sm:$0xff]  ;;  %s619_s10 = smov 32   ;;  %vm305_vm9 = vcmask 254976   ;;  %s324_s15 = sshll.u32 %s726_s6, 4  ;;  %s325_s15 = int_to_ptr.hbm [resolvable:$true] %s324_s15 }
  0x19   :  { %127 = vmatpush.msra.mxu0 %v109_v2  ;;  %v105_v5 = vld [vmem:[#allocation10 + $0x10] sm:$0xff]  ;;  %v155_v6 = vld [vmem:[#allocation8] sm:$0xff]  ;;  %v100_v7 = vld [vmem:[#allocation2] sm:$0x3]  ;;  %s621_s16 = smov [#allocation11]   ;;  %s622_s18 = smov [#allocation12]  }
  0x1a   :  { %175 = vmatpush.msra.mxu2 %v157_v1  ;;  %v103_v8 = vld [vmem:[#allocation10] sm:$0xff]  ;;  %v684_v9 = vld [vmem:[#allocation5] sm:$0x3]  ;;  %v389_v11 = vld [vmem:[%s725_s5] ss:$0 sm:$0xff]  ;;  %s322_s17 = sshll.u32 %s621_s16, 4  ;;  %s323_s17 = int_to_ptr.vmem [resolvable:$true] %s322_s17 }
  0x1b   :  { %128 = vmatpush.msra.mxu0 %v107_v4  ;;  %v101_v16 = vld [vmem:[#allocation7] sm:$0x3]  ;;  %v231_v38 = vld [vmem:[#allocation8 + $0x30] sm:$0xff]  ;;  %v230_v40 = vld [vmem:[#allocation8 + $0x28] sm:$0xff]  ;;  %s333_s1 = sshll.u32 %s622_s18, 4  ;;  %s335_s21 = sshll.u32 %s727_s7, 4  ;;  %s334_s1 = int_to_ptr.vmem [resolvable:$true] %s333_s1  ;;  %s336_s21 = int_to_ptr.hbm [resolvable:$true] %s335_s21 }
  0x1c   :  { %176 = vmatpush.msra.mxu2 %v156_v3  ;;  %v232_v37 = vld [vmem:[#allocation8 + $0x38] sm:$0xff]  ;;  %v229_v41 = vld [vmem:[#allocation8 + $0x20] sm:$0xff]  ;;  %v108_v44 = vld [vmem:[#allocation10 + $0x28] sm:$0xff]  ;;  %s623_s22 = smov [#allocation14]   ;;  %s346_s24 = sshll.u32 %s728_s8, 4  ;;  %s347_s24 = int_to_ptr.hbm [resolvable:$true] %s346_s24 }
  0x1d   :  { %129 = vmatpush.msra.mxu0 %v105_v5  ;;  %250 = vmatpush.msra.mxu3 %v232_v37  ;;  %v110_v39 = vld [vmem:[#allocation10 + $0x38] sm:$0xff]  ;;  %v104_v46 = vld [vmem:[#allocation10 + $0x8] sm:$0xff]  ;;  %s344_s6 = sshll.u32 %s623_s22, 4  ;;  %s345_s6 = int_to_ptr.vmem [resolvable:$true] %s344_s6 }
  0x1e   :  { %177 = vmatpush.msra.mxu2 %v155_v6  ;;  %147 = vmatpush.msra.mxu1 %v110_v39  ;;  %v106_v45 = vld [vmem:[#allocation10 + $0x18] sm:$0xff] }
  0x1f   :  { %369 = vmatmul.msk.f32.vlgmr.msra.gmra.mxu2 %vm111_vm0, %v100_v7  ;;  %130 = vmatpush.msra.mxu0 %v103_v8  ;;  %v390_v49 = vld [vmem:[%s725_s5 + $0x1] ss:$0 sm:$0xff]  ;;  %s620_s5 = smov 96  }
  0x20   :  { %367 = vmatmul.msk.f32.vlgmr.msra.gmra.mxu0 %vm111_vm0, %v684_v9  ;;  %251 = vmatpush.msra.mxu3 %v231_v38 }
  0x21   :  { %148 = vmatpush.msra.mxu1 %v108_v44 }
  0x22   :  { %252 = vmatpush.msra.mxu3 %v230_v40 }
  0x23   :  { %149 = vmatpush.msra.mxu1 %v106_v45 }
  0x24   :  { %253 = vmatpush.msra.mxu3 %v229_v41 }
  0x25   :  { %150 = vmatpush.msra.mxu1 %v104_v46 }
  0x26   :  { %368 = vmatmul.msk.f32.vlgmr.msra.gmra.mxu1 %vm111_vm0, %v684_v9 }
  0x9d   :  { %v132_v10 = vpop.f32.mrf.mxu0 }
  0xa2   :  { %v179_v12 = vpop.f32.mrf.mxu2 }
  0xa3   :  { %v180_v13 = vadd.f32 %v179_v12, %v132_v10  ;;  %v152_v48 = vpop.f32.mrf.mxu1 }
  0xa5   :  { %v186_v14 = vadd.f32 %v389_v11, %v180_v13 }
  0xa7   :  { %391 = vtanh.f32 %v186_v14  ;;  %v370_v17 = vmul.f32 -1.442695, %v186_v14 }
  0xa9   :  { %393 = vpow2.f32 %v370_v17 }
  0xad   :  { %v392_v15 = vpop.eup %391 }
  0xae   :  { %213 = vrot.lane.b32.xlu0 %v392_v15, %s618_s9 }
  0xaf   :  { %v394_v18 = vpop.eup %393 }
  0xb0   :  { %v190_v19 = vadd.f32 1.0, %v394_v18 }
  0xb2   :  { %395 = vrcp.f32 %v190_v19  ;;  %v202_v25 = vand.u32 2147483648, %v190_v19  ;;  %vm196_vm2 = vweird.f32 %v190_v19  ;;  %v200_v26 = vand.u32 2147483647, %v190_v19 }
  0xb4   :  { %v203_v28 = vor.u32 1.1754944e-38, %v202_v25  ;;  %vm201_vm4 = vcmp.eq.f32.partialorder %v200_v26, 8.507059e+37 }
  0xb6   :  { %208 = vrot.lane.b32.xlu0 %v101_v16, %s619_s10 }
  0xb8   :  { %v396_v20 = vpop.eup %395 }
  0xb9   :  { %v192_v21 = vmul.f32 %v396_v20, %v190_v19  ;;  %vm197_vm1 = vweird.f32 %v396_v20 }
  0xba   :  { %vm198_vm3 = vmor %vm196_vm2, %vm197_vm1 }
  0xbb   :  { %v193_v22 = vsub.f32 1.0, %v192_v21 }
  0xbd   :  { %v194_v23 = vmul.f32 %v396_v20, %v193_v22 }
  0xbf   :  { %v195_v24 = vadd.f32 %v396_v20, %v194_v23 }
  0xc1   :  { %v199_v27 = vsel %vm198_vm3, %v396_v20, %v195_v24 }
  0xc2   :  { %v204_v30 = vsel %vm201_vm4, %v203_v28, %v199_v27 }
 0x120   :  { %v214_v29 = vpop.permute.xlu0 %213 }
 0x121   :  { %v216_v31 = vmul.f32 %v214_v29, %v204_v30 }
 0x123   :  { %218 = vrot.lane.b32.xlu1 %v216_v31, %s619_s10 }
 0x128   :  { %v209_v32 = vpop.permute.xlu0 %208 }
 0x129   :  { %v211_v33 = vmul.f32 %v209_v32, %v204_v30 }
 0x195   :  { %v219_v34 = vpop.permute.xlu1 %218 }
 0x196   :  { %v221_v35 = vadd.f32 %v219_v34, %v211_v33 }
 0x198   :  { %397 = vtanh.f32 %v221_v35 }
 0x19e   :  { %v398_v36 = vpop.eup %397 }
 0x19f   :  { %224 = vrot.lane.b32.xlu1 %v398_v36, %s618_s9 }
 0x211   :  { %v225_v42 = vpop.permute.xlu1 %224 }
 0x212   :  { %v227_v43 = vmul.f32 %v225_v42, %v204_v30 }
 0x214   :  { %234 = vrot.lane.b32.xlu2 %v227_v43, %s619_s10 }
 0x26e   :  { %v235_v47 = vpop.permute.xlu2 %234 }
 0x26f   :  { %371 = vmatmul.msk.f32.vlgmr.msra.gmra.mxu3 %vm111_vm0, %v235_v47 }
 0x2f2   :  { %v255_v50 = vpop.f32.mrf.mxu3 }
 0x2f3   :  { %v256_v51 = vadd.f32 %v255_v50, %v152_v48 }
 0x2f5   :  { %v263_v52 = vadd.f32 %v390_v49, %v256_v51 }
 0x2f7   :  { %399 = vtanh.f32 %v263_v52  ;;  %v373_v54 = vmul.f32 -1.442695, %v263_v52 }
 0x2f9   :  { %401 = vpow2.f32 %v373_v54 }
 0x2fd   :  { %v400_v53 = vpop.eup %399 }
 0x2fe   :  { %286 = vrot.lane.b32.xlu2 %v400_v53, %s618_s9 }
 0x2ff   :  { %v402_v55 = vpop.eup %401 }
 0x300   :  { %v267_v56 = vadd.f32 1.0, %v402_v55 }
 0x302   :  { %403 = vrcp.f32 %v267_v56  ;;  %v279_v62 = vand.u32 2147483648, %v267_v56  ;;  %vm273_vm6 = vweird.f32 %v267_v56  ;;  %v277_v63 = vand.u32 2147483647, %v267_v56 }
 0x304   :  { %v280_v1 = vor.u32 1.1754944e-38, %v279_v62  ;;  %vm278_vm8 = vcmp.eq.f32.partialorder %v277_v63, 8.507059e+37 }
 0x308   :  { %v404_v57 = vpop.eup %403 }
 0x309   :  { %v269_v58 = vmul.f32 %v404_v57, %v267_v56  ;;  %vm274_vm5 = vweird.f32 %v404_v57 }
 0x30a   :  { %vm275_vm7 = vmor %vm273_vm6, %vm274_vm5 }
 0x30b   :  { %v270_v59 = vsub.f32 1.0, %v269_v58 }
 0x30d   :  { %v271_v60 = vmul.f32 %v404_v57, %v270_v59 }
 0x30f   :  { %v272_v61 = vadd.f32 %v404_v57, %v271_v60 }
 0x311   :  { %v276_v0 = vsel %vm275_vm7, %v404_v57, %v272_v61 }
 0x312   :  { %v281_v3 = vsel %vm278_vm8, %v280_v1, %v276_v0 }
 0x313   :  { %v284_v5 = vmul.f32 %v281_v3, %v221_v35 }
 0x358   :  { %v287_v2 = vpop.permute.xlu2 %286 }
 0x359   :  { %v289_v4 = vmul.f32 %v287_v2, %v281_v3 }
 0x35b   :  { %291 = vrot.lane.b32.xlu0 %v289_v4, %s619_s10 }
 0x363   :  { %302 = vrot.lane.b32.xlu0 %v281_v3, %s619_s10 }
 0x3cd   :  { %v292_v6 = vpop.permute.xlu0 %291 }
 0x3ce   :  { %v294_v7 = vadd.f32 %v292_v6, %v284_v5 }
 0x3d0   :  { %405 = vtanh.f32 %v294_v7 }
 0x3d5   :  { %v303_v8 = vpop.permute.xlu0 %302 }
 0x3d6   :  { %v406_v9 = vpop.eup %405  ;;  %306 = vst.msk [vmem:[#allocation11] sm:$0x3] %vm305_vm9, %v303_v8 }
 0x3d7   :  { %297 = vrot.lane.b32.xlu1 %v406_v9, %s618_s9  ;;  %327 = dma.vmem_to_hbm [thread:$0]  %s323_s17, 32, %s325_s15, [#allocation4]  }
 0x3df   :  { %313 = vrot.lane.b32.xlu1 %v294_v7, %s620_s5 }
 0x449   :  { %v298_v10 = vpop.permute.xlu1 %297 }
 0x44a   :  { %v300_v11 = vmul.f32 %v298_v10, %v281_v3 }
 0x44c   :  { %308 = vrot.lane.b32.xlu2 %v300_v11, %s619_s10 }
 0x451   :  { %v314_v12 = vpop.permute.xlu1 %313 }
 0x452   :  { %316 = vst.msk [vmem:[#allocation14] sm:$0x3] %vm305_vm9, %v314_v12 }
 0x4a6   :  { %v309_v13 = vpop.permute.xlu2 %308 }
 0x4a7   :  { %311 = vst.msk [vmem:[#allocation12] sm:$0x3] %vm305_vm9, %v309_v13 }
 0x4a8   :  { %338 = dma.vmem_to_hbm [thread:$0]  %s334_s1, 32, %s336_s21, [#allocation13]  }
 0x4a9   :  { %349 = dma.vmem_to_hbm [thread:$0]  %s345_s6, 32, %s347_s24, [#allocation13]  }
 0x4aa   :  { %605 = dma.done.wait [#allocation4], 32  }
 0x4ab   :  { %606 = vsyncadd [#allocation4], 4294967264 }
 0x4ac   :  { %607 = dma.done.wait [#allocation13], 64  }
 0x4ad   :  { %608 = vsyncadd [#allocation13], 4294967232 }
 0x4ae   :  { %362 = vsyncpa [#allocation3], 1 }
 0x4af   :  { %363 = vsyncpa [#allocation6], 1 }
 0x4b0   :  { %364 = vsyncpa [#allocation9], 1 }
 0x4b1   :  { %365 = vsyncpa [#allocation4], 1 }
 0x4b2   :  { %366 = vsyncpa [#allocation13], 1 }

</bundles_post_ra>
